<compile_context>
chip_gen: v6e
topology: v6e:2x2x1
jax: 0.10.0
libtpu: 0.0.40
codegen_flags: <defaults>
</compile_context>

<pallas_src>
import jax
import jax.numpy as jnp
from jax import lax
from jax.experimental import pallas as pl
from jax.experimental.pallas import tpu as pltpu


# ---------------------------------------------------------------------------
# Kernels
# ---------------------------------------------------------------------------
def _attn_kernel(x_ref, xt_ref, attn_ref, acc_ref):
    """Pass 1: attention = softmax(x @ xt^T) for one batch element.

    Grid: (B, F_tiles).  x_ref/xt_ref: (1, H, TF) f32 blocks.
    acc_ref: (H, H) f32 scratch (logits accumulator across F tiles).
    attn_ref: (1, H, H) bf16 output, written on the last F tile.
    """
    k = pl.program_id(1)

    @pl.when(k == 0)
    def _():
        acc_ref[...] = jnp.zeros_like(acc_ref)

    x = x_ref[0].astype(jnp.bfloat16)    # (H, TF)
    xt = xt_ref[0].astype(jnp.bfloat16)  # (H, TF)

    # Contract over the lane (F) dim of BOTH operands -> no transpose is
    # materialized; MXU consumes the RHS directly.  f32 accumulation.
    acc_ref[...] += lax.dot_general(
        x, xt,
        dimension_numbers=(((1,), (1,)), ((), ())),
        preferred_element_type=jnp.float32)

    @pl.when(k == pl.num_programs(1) - 1)
    def _():
        logits = acc_ref[...]                               # (H, H) f32
        m = jnp.max(logits, axis=-1, keepdims=True)
        e = jnp.exp(logits - m)
        denom = jnp.sum(e, axis=-1, keepdims=True)
        # approx=True -> EUP vrcp slot (otherwise idle); ~1e-3 rel error,
        # acceptable for softmax normalization.
        attn = e * pl.reciprocal(denom, approx=True)
        attn_ref[0] = attn.astype(attn_ref.dtype)


def _apply_kernel(attn_ref, g_ref, o_ref):
    """Pass 2: out tile = attention @ g tile for one (batch, F-tile)."""
    attn = attn_ref[0]                       # (H, H) bf16
    g = g_ref[0].astype(jnp.bfloat16)        # (H, TF)
    o_ref[0] = jnp.dot(
        attn, g, preferred_element_type=jnp.float32).astype(o_ref.dtype)


# ---------------------------------------------------------------------------
# Tiling helpers + pallas_call wrappers
# ---------------------------------------------------------------------------
def _choose_f_tile(F, H, budget_bytes=16 << 20):
    """Pick a feature-axis tile TF dividing F.

    Budget covers the double-buffered f32 x/xt input blocks of pass 1
    (2 inputs * 2 buffers * H * TF * 4 bytes).
    """
    cap = max(128, budget_bytes // (16 * max(H, 1)))
    if F <= cap:
        return F
    # Largest divisor of F that is a multiple of 128 (lane-dense) and <= cap.
    t = (cap // 128) * 128
    while t >= 128:
        if F % t == 0:
            return t
        t -= 128
    # No suitable 128-multiple divisor: fall back to the whole axis (layout
    # constraints require either full-extent or 128-multiple lane blocks).
    return F


def _sa_coronal_flat(x_flat, xt_flat, g_flat, *, f_tile=None):
    """x_flat, xt_flat, g_flat: (B, H, F) f32 -> (B, H, F) f32."""
    B, H, F = x_flat.shape
    tf = f_tile if f_tile is not None else _choose_f_tile(F, H)
    assert F % tf == 0, (F, tf)
    nf = F // tf

    # Raised above the v5e 16 MiB / v7x 32 MiB default scoped limits; actual
    # per-step usage is bounded by the F-tile budget well below this.
    vmem_limit = 48 * 1024 * 1024

    # ---- Pass 1: attention = softmax(x @ xt^T) ----------------------------
    attn = pl.pallas_call(
        _attn_kernel,
        out_shape=jax.ShapeDtypeStruct((B, H, H), jnp.bfloat16),
        grid_spec=pltpu.PrefetchScalarGridSpec(
            num_scalar_prefetch=0,
            grid=(B, nf),
            in_specs=[
                pl.BlockSpec((1, H, tf), lambda b, k: (b, 0, k)),
                pl.BlockSpec((1, H, tf), lambda b, k: (b, 0, k)),
            ],
            out_specs=pl.BlockSpec((1, H, H), lambda b, k: (b, 0, 0)),
            scratch_shapes=[pltpu.VMEM((H, H), jnp.float32)],
        ),
        compiler_params=pltpu.CompilerParams(
            dimension_semantics=("parallel", "arbitrary"),
            vmem_limit_bytes=vmem_limit),
    )(x_flat, xt_flat)

    # ---- Pass 2: out = attention @ g --------------------------------------
    out = pl.pallas_call(
        _apply_kernel,
        out_shape=jax.ShapeDtypeStruct((B, H, F), x_flat.dtype),
        grid_spec=pltpu.PrefetchScalarGridSpec(
            num_scalar_prefetch=0,
            grid=(B, nf),
            in_specs=[
                pl.BlockSpec((1, H, H), lambda b, j: (b, 0, 0)),
                pl.BlockSpec((1, H, tf), lambda b, j: (b, 0, j)),
            ],
            out_specs=pl.BlockSpec((1, H, tf), lambda b, j: (b, 0, j)),
        ),
        compiler_params=pltpu.CompilerParams(
            dimension_semantics=("parallel", "parallel"),
            vmem_limit_bytes=vmem_limit),
    )(attn, g_flat)
    return out


def sa_coronal_block(x_, x_t, g_x, *, f_tile=None):
    """JAX/Pallas equivalent of saCoronalBlock.forward.

    x_, x_t, g_x: (B, C, D, H, W) arrays.  Returns (B, C, D, H, W).

    Note: the attention math is invariant to the ordering inside the flattened
    feature axis, so we use the (B,H,C,D,W) flatten (and its inverse on the
    way out) instead of PyTorch's (B,H,D,C,W); results are identical.
    """
    B, C, D, H, W = x_.shape
    F = C * D * W

    def to_flat(t):
        # (B, C, D, H, W) -> (B, H, C, D, W) -> (B, H, C*D*W)
        return jnp.transpose(t, (0, 3, 1, 2, 4)).reshape(B, H, F)

    x_flat = to_flat(x_)
    xt_flat = to_flat(x_t)   # the kernel contracts over F directly (no .T)
    g_flat = to_flat(g_x)

    out_flat = _sa_coronal_flat(x_flat, xt_flat, g_flat, f_tile=f_tile)

    # (B, H, F) -> (B, H, C, D, W) -> (B, C, D, H, W)
    out = out_flat.reshape(B, H, C, D, W)
    return jnp.transpose(out, (0, 2, 3, 1, 4))


# ---------------------------------------------------------------------------
# Reference (mirrors the PyTorch forward's exact permute ordering; bf16 MXU
# matmuls with f32 accumulation to match the kernel's mixed precision).
# ---------------------------------------------------------------------------
def _reference(x_, x_t, g_x):
    B, C, D, H, W = x_.shape
    F = D * C * W
    xf = jnp.transpose(x_, (0, 3, 2, 1, 4)).reshape(B, H, F)
    xtf = jnp.transpose(x_t, (0, 3, 2, 1, 4)).reshape(B, H, F)
    gf = jnp.transpose(g_x, (0, 3, 2, 1, 4)).reshape(B, H, F)
    logits = jnp.einsum(
        "bhf,bkf->bhk",
        xf.astype(jnp.bfloat16), xtf.astype(jnp.bfloat16),
        preferred_element_type=jnp.float32)
    attn = jax.nn.softmax(logits, axis=-1).astype(jnp.bfloat16)
    outf = jnp.einsum(
        "bhk,bkf->bhf",
        attn, gf.astype(jnp.bfloat16),
        preferred_element_type=jnp.float32).astype(jnp.float32)
    out = outf.reshape(B, H, D, C, W)
    return jnp.transpose(out, (0, 3, 2, 1, 4))


if __name__ == "__main__":
    # Small shapes: B=2, C=4, D=8, H=16 (coronal), W=8  ->  F = C*D*W = 256
    B, C, D, H, W = 2, 4, 8, 16, 8
    key = jax.random.PRNGKey(0)
    k1, k2, k3 = jax.random.split(key, 3)
    x_ = jax.random.normal(k1, (B, C, D, H, W), dtype=jnp.float32)
    x_t = jax.random.normal(k2, (B, C, D, H, W), dtype=jnp.float32)
    g_x = jax.random.normal(k3, (B, C, D, H, W), dtype=jnp.float32)

    out = jax.block_until_ready(sa_coronal_block(x_, x_t, g_x))
    ref = jax.block_until_ready(_reference(x_, x_t, g_x))

    assert out.shape == (B, C, D, H, W)
    assert jnp.allclose(out, ref, atol=2e-2, rtol=2e-2), "mismatch vs reference"

    print("KERNEL_OK")
</pallas_src>

<mosaic_0001>
module attributes {stable_mosaic.version = 11 : i64} {
  func.func @_attn_kernel(%arg0: i32, %arg1: i32, %arg2: memref<1x16x256xf32, #tpu.memory_space<vmem>>, %arg3: memref<1x16x256xf32, #tpu.memory_space<vmem>>, %arg4: memref<1x16x16xbf16, #tpu.memory_space<vmem>>, %arg5: memref<16x16xf32, #tpu.memory_space<vmem>>) attributes {dimension_semantics = [#tpu.dimension_semantics<parallel>, #tpu.dimension_semantics<arbitrary>], iteration_bounds = array<i64: 2, 1>, scalar_prefetch = 0 : i64, scratch_operands = 1 : i64, tpu.core_type = #tpu.core_type<tc>, window_params = [{transform_indices = @transform_0, window_bounds = array<i64: 1, 16, 256>}, {transform_indices = @transform_1, window_bounds = array<i64: 1, 16, 256>}, {transform_indices = @transform_2, window_bounds = array<i64: 1, 16, 16>}]} {
    %c0_i32 = arith.constant 0 : i32
    %0 = arith.cmpi eq, %arg1, %c0_i32 : i32
    %1 = arith.extui %0 : i1 to i32
    %c0_i32_0 = arith.constant 0 : i32
    %2 = arith.cmpi ne, %1, %c0_i32_0 : i32
    scf.if %2 {
      %cst_12 = arith.constant 0.000000e+00 : f32
      %16 = vector.broadcast %cst_12 : f32 to vector<16x16xf32>
      %c0_13 = arith.constant 0 : index
      %c0_14 = arith.constant 0 : index
      %17 = vector.load %arg5[%c0_13, %c0_14] : memref<16x16xf32, #tpu.memory_space<vmem>>, vector<16x16xf32>
      tpu.vector_store %arg5[%c0_13, %c0_14], %16 {strides = array<i32>} : memref<16x16xf32, #tpu.memory_space<vmem>>, vector<16x16xf32>,
    } else {
    }
    %c0 = arith.constant 0 : index
    %c0_1 = arith.constant 0 : index
    %c0_2 = arith.constant 0 : index
    %3 = vector.load %arg2[%c0, %c0_1, %c0_2] : memref<1x16x256xf32, #tpu.memory_space<vmem>>, vector<1x16x256xf32>
    %4 = vector.shape_cast %3 : vector<1x16x256xf32> to vector<16x256xf32>
    %5 = arith.truncf %4 : vector<16x256xf32> to vector<16x256xbf16>
    %c0_3 = arith.constant 0 : index
    %c0_4 = arith.constant 0 : index
    %c0_5 = arith.constant 0 : index
    %6 = vector.load %arg3[%c0_3, %c0_4, %c0_5] : memref<1x16x256xf32, #tpu.memory_space<vmem>>, vector<1x16x256xf32>
    %7 = vector.shape_cast %6 : vector<1x16x256xf32> to vector<16x256xf32>
    %8 = arith.truncf %7 : vector<16x256xf32> to vector<16x256xbf16>
    %c0_6 = arith.constant 0 : index
    %c0_7 = arith.constant 0 : index
    %9 = vector.load %arg5[%c0_6, %c0_7] : memref<16x16xf32, #tpu.memory_space<vmem>>, vector<16x16xf32>
    %cst = arith.constant dense<0.000000e+00> : vector<16x16xf32>
    %10 = tpu.matmul %5, %8, %cst {dimension_numbers = #tpu.dot_dimension_numbers<[1], [1], [0], [0], [0, 0, 1, 0], [], []>} : vector<16x256xbf16>, vector<16x256xbf16>, vector<16x16xf32> -> vector<16x16xf32>
    %11 = arith.addf %9, %10 : vector<16x16xf32>
    %c0_8 = arith.constant 0 : index
    %c0_9 = arith.constant 0 : index
    %12 = vector.load %arg5[%c0_8, %c0_9] : memref<16x16xf32, #tpu.memory_space<vmem>>, vector<16x16xf32>
    tpu.vector_store %arg5[%c0_8, %c0_9], %11 {strides = array<i32>} : memref<16x16xf32, #tpu.memory_space<vmem>>, vector<16x16xf32>,
    %c0_i32_10 = arith.constant 0 : i32
    %13 = arith.cmpi eq, %arg1, %c0_i32_10 : i32
    %14 = arith.extui %13 : i1 to i32
    %c0_i32_11 = arith.constant 0 : i32
    %15 = arith.cmpi ne, %14, %c0_i32_11 : i32
    scf.if %15 {
      %c0_12 = arith.constant 0 : index
      %c0_13 = arith.constant 0 : index
      %16 = vector.load %arg5[%c0_12, %c0_13] : memref<16x16xf32, #tpu.memory_space<vmem>>, vector<16x16xf32>
      %cst_14 = arith.constant dense<0xFF800000> : vector<16xf32>
      %17 = vector.multi_reduction <maximumf>, %16, %cst_14 [1] : vector<16x16xf32> to vector<16xf32>
      %18 = vector.shape_cast %17 : vector<16xf32> to vector<16x1xf32>
      %19 = vector.broadcast %18 : vector<16x1xf32> to vector<16x16xf32>
      %20 = arith.subf %16, %19 : vector<16x16xf32>
      %21 = math.exp %20 : vector<16x16xf32>
      %cst_15 = arith.constant dense<0.000000e+00> : vector<16xf32>
      %22 = vector.multi_reduction <add>, %21, %cst_15 [1] : vector<16x16xf32> to vector<16xf32>
      %23 = vector.shape_cast %22 : vector<16xf32> to vector<16x1xf32>
      %24 = tpu.reciprocal %23 {approx = true} : vector<16x1xf32> -> vector<16x1xf32>
      %25 = vector.broadcast %24 : vector<16x1xf32> to vector<16x16xf32>
      %26 = arith.mulf %21, %25 : vector<16x16xf32>
      %27 = arith.truncf %26 : vector<16x16xf32> to vector<16x16xbf16>
      %c0_16 = arith.constant 0 : index
      %c0_17 = arith.constant 0 : index
      %c0_18 = arith.constant 0 : index
      %28 = vector.load %arg4[%c0_16, %c0_17, %c0_18] : memref<1x16x16xbf16, #tpu.memory_space<vmem>>, vector<1x16x16xbf16>
      %29 = vector.shape_cast %28 : vector<1x16x16xbf16> to vector<16x16xbf16>
      %30 = vector.shape_cast %27 : vector<16x16xbf16> to vector<1x16x16xbf16>
      tpu.vector_store %arg4[%c0_16, %c0_17, %c0_18], %30 {strides = array<i32>} : memref<1x16x16xbf16, #tpu.memory_space<vmem>>, vector<1x16x16xbf16>,
    } else {
    }
    return
  }
  func.func @transform_0(%arg0: i32, %arg1: i32) -> (i32, i32, i32) {
    %c0_i32 = arith.constant 0 : i32
    %c0_i32_0 = arith.constant 0 : i32
    return %arg0, %c0_i32, %arg1 : i32, i32, i32
  }
  func.func @transform_1(%arg0: i32, %arg1: i32) -> (i32, i32, i32) {
    %c0_i32 = arith.constant 0 : i32
    %c0_i32_0 = arith.constant 0 : i32
    return %arg0, %c0_i32, %arg1 : i32, i32, i32
  }
  func.func @transform_2(%arg0: i32, %arg1: i32) -> (i32, i32, i32) {
    %c0_i32 = arith.constant 0 : i32
    %c0_i32_0 = arith.constant 0 : i32
    %c0_i32_1 = arith.constant 0 : i32
    return %arg0, %c0_i32, %c0_i32_0 : i32, i32, i32
  }
}

</mosaic_0001>

<bundles_post_ra>
// kernel: tpu_custom_call.1
= control target key start
LH: loop header
LB: loop body
LE: loop exit
PB: predicated region body
PF: predicated region fallthrough
CT: control target
= control target key end

     0   :  { %7 = vsyncpa [#allocation4], 0  ;;  %s915_s0 = inlined_call_operand.hbm [shape: f32[2,16,256], index: 0, kind: input, shape index: {}]   ;;  %s916_s1 = inlined_call_operand.hbm [shape: f32[2,16,256], index: 1, kind: input, shape index: {}]   ;;  %s917_s2 = inlined_call_operand.hbm [shape: bf16[2,16,16], index: 2, kind: output, shape index: {}]  }
   0x1   :  { %9 = vsyncpa [#allocation4 + $0x1], 0 }
   0x2   :  { %10 = vsyncpa [#allocation7], 0 }
   0x3   :  { %12 = vsyncpa [#allocation7 + $0x1], 0 }
   0x4   :  { %13 = vsyncpa [#allocation5], 0 }
   0x5   :  { %15 = vsyncpa [#allocation5 + $0x1], 0  ;;  %s725_s9 = smov 0   ;;  %s727_s10 = smov 0  }
   0x6   :  { %s729_s11 = smov 0   ;;  %s731_s12 = smov 0  }
   0x7   :  { %s733_s13 = smov 0   ;;  %s735_s14 = smov 0  }
   0x8 LB: > { %s454_s15 = sadd.s32 4294967295, %s700_s14   ;;  %s455_s16 = sadd.s32 4294967294, %s700_s14   ;;  %s700_s14 = sphi %s735_s14, %s21_s14   ;;  %s696_s13 = sphi %s733_s13, %s928_s13   ;;  %s692_s12 = sphi %s731_s12, %s927_s12   ;;  %s688_s11 = sphi %s729_s11, %s926_s11   ;;  %s684_s10 = sphi %s727_s10, %s925_s10   ;;  %s680_s9 = sphi %s725_s9, %s924_s9  }
   0x9   : > { %s33_s17 = sadd.s32 1, %s696_s13  ;;  %s42_s18 = sadd.s32 1, %s688_s11 }
   0xa   : > { %p35_p0 = scmp.ge.s32.totalorder %s33_s17, 2  ;;  %p49_p1 = scmp.ne.s32.totalorder %s688_s11, %s684_s10 }
   0xb   : > { %p50_p2 = scmp.eq.s32.totalorder %s700_s14, 0  ;;  %p55_p3 = scmp.ne.s32.totalorder %s684_s10, %s680_s9 }
   0xc   : > { %s930_s17 = smov (%p35_p0, %s33_s17), 0  ;;  %p56_p5 = scmp.eq.s32.totalorder %s454_s15, 0 }
   0xd   : > { %p766_p4 = por %p50_p2, %p49_p1  ;;  %s37_s20 = ssub.s32 %s696_s13, %s930_s17 }
   0xe   : > { %p107_p6 = scmp.eq.s32.totalorder %s454_s15, 1  ;;  %p40_p7 = scmp.eq.s32.totalorder %s37_s20, 0 }
   0xf   : > { %p772_p8 = por %p56_p5, %p55_p3  ;;  %p113_p10 = scmp.eq.s32.totalorder %s455_s16, 1 }
  0x10   : > { %p776_p9 = por %p107_p6, %p49_p1  ;;  %p457_p12 = scmp.ge.s32.totalorder %s700_s14, 2 }
  0x11   : > { %s781_s23 = scalar_select %p40_p7, %s688_s11, %s42_s18  }
  0x12   : > { %p783_p11 = por %p113_p10, %p55_p3  ;;  %p497_p13 = scmp.lt.s32.totalorder %s700_s14, 2 }
  0x13   : > { %s790_s25 = sand.u32 1, %s688_s11   ;;  %s475_s27 = sshll.u32 %s696_s13, 9 }
  0x14   : > { %s458_s26 = sshll.u32 %s790_s25, 5  ;;  %s145_s30 = scalar_lea.hbm %s915_s0, %s475_s27 }
  0x15   : > { %s137_s3 = scalar_lea.vmem [#allocation3], %s458_s26  ;;  %p803_p0 = pnand %p497_p13, %p766_p4 }
  0x16   : > { %s146_s4 = sshll.u32 %s137_s3, 4  ;;  %p464_p1 = scmp.ge.s32.totalorder %s700_s14, 1  ;;  %s147_s4 = int_to_ptr.vmem [resolvable:$true] %s146_s4 }
  0x17   : > { %s134_s6 = scalar_lea.sflag [#allocation4], %s790_s25  ;;  %p562_p2 = pneg %p803_p0 }
  0x18   : > { %s573_s7 = scalar_lea.vmem %s147_s4, 512  ;;  %s702_s8 = smov [#allocation3]  }
  0x19   : > { %p574_p3 = scmp.ne.s32.totalorder %s147_s4, %s573_s7  ;;  %s578_s15 = sshll.u32 %s702_s8, 4  ;;  %s579_s15 = int_to_ptr.vmem [resolvable:$false] %s578_s15 }
  0x1a   : > { %s580_s16 = scalar_lea.vmem %s579_s15, 1024  ;;  %p581_p4 = scmp.lt.s32.totalorder %s147_s4, %s579_s15 }
  0x1b   : > { %p576_p5 = pnand %p574_p3, %p562_p2  ;;  %p582_p7 = scmp.lt.s32.totalorder %s580_s16, %s573_s7 }
  0x1d   : > { %p577_p6 = pneg %p576_p5  ;;  %p583_p10 = por %p582_p7, %p581_p4 }
  0x1f   : > { %p584_p13 = pnand %p583_p10, %p577_p6 }
  0x21   : > { %587 = shalt.err (!%p584_p13)
}
  0x22   : > { %s703_s18 = smov 256   ;;  %s704_s19 = smov 16  }
  0x23   : > { %489 = dma.hbm_to_vmem [thread:$0]  (!%p803_p0), %s145_s30, 512, %s147_s4, %s134_s6, %s703_s18, %s703_s18, %s704_s19  }
  0x24   : > { %p177_p3 = scmp.lt.s32.totalorder %s700_s14, 3  ;;  %s168_s29 = scalar_lea.hbm %s916_s1, %s475_s27 }
  0x25   : > { %s160_s7 = scalar_lea.vmem [#allocation6], %s458_s26  ;;  %s157_s15 = scalar_lea.sflag [#allocation7], %s790_s25 }
  0x26   : > { %p824_p5 = pnand %p464_p1, %p177_p3  ;;  %s169_s8 = sshll.u32 %s160_s7, 4  ;;  %s170_s8 = int_to_ptr.vmem [resolvable:$true] %s169_s8 }
  0x27   : > { %s601_s16 = scalar_lea.vmem %s170_s8, 512  ;;  %s705_s30 = smov [#allocation6]  }
  0x28   : > { %p602_p6 = scmp.ne.s32.totalorder %s170_s8, %s601_s16  ;;  %s606_s4 = sshll.u32 %s705_s30, 4  ;;  %s607_s4 = int_to_ptr.vmem [resolvable:$false] %s606_s4 }
  0x29   : > { %s608_s27 = scalar_lea.vmem %s607_s4, 1024  ;;  %p609_p10 = scmp.lt.s32.totalorder %s170_s8, %s607_s4 }
  0x2a   : > { %p604_p4 = pnand %p602_p6, %p562_p2  ;;  %p610_p1 = scmp.lt.s32.totalorder %s608_s27, %s601_s16 }
  0x2c   : > { %p605_p7 = pneg %p604_p4  ;;  %p611_p13 = por %p610_p1, %p609_p10 }
  0x2e   : > { %p612_p3 = pnand %p611_p13, %p605_p7 }
  0x30   : > { %615 = shalt.err (!%p612_p3)
}
  0x31   : > { %492 = dma.hbm_to_vmem [thread:$0]  (!%p803_p0), %s168_s29, 512, %s170_s8, %s157_s15, %s703_s18, %s703_s18, %s704_s19  }
  0x32   : > { %181 = sbr.rel (%p824_p5) target bundleno = 604 (0x25c), region = 28  ;;  %s839_s25 = sand.u32 (!%p824_p5), 1, %s684_s10  }
  0x33   : > { %s465_s26 = sshll.u32 (!%p824_p5), %s839_s25, 5  ;;  %s184_s6 = scalar_lea.sflag (!%p824_p5), [#allocation4], %s839_s25 }
  0x34   : > { %s187_s20 = scalar_lea.vmem (!%p824_p5), [#allocation3], %s465_s26 }
  0x37   : > { %667 = dma.done.wait (%p772_p8), %s184_s6, 512  }
  0x38   : > { %669 = vsyncadd (%p772_p8), %s184_s6, 4294966784  ;;  %s193_s5 = scalar_lea.sflag [#allocation7], %s839_s25  ;;  %s196_s18 = scalar_lea.vmem [#allocation6], %s465_s26 }
  0x39   : > { %671 = dma.done.wait (%p772_p8), %s193_s5, 512  }
  0x3a   : > { %673 = vsyncadd (%p772_p8), %s193_s5, 4294966784  ;;  %vm229_vm0 = vcmask 130048   ;;  %v706_v0 = vmov 0.0   ;;  %v239_v1 = vld [vmem:[%s196_s18 + $0x8] sm:$0xff]  ;;  %v241_v2 = vld [vmem:[%s196_s18 + $0x18] sm:$0xff]  ;;  %s467_s21 = sshll.u32 %s839_s25, 3 }
  0x3b   : > { %230 = vst.msk [vmem:[#allocation2] sm:$0xff] %vm229_vm0, %v706_v0  ;;  %231 = vst.msk [vmem:[#allocation2 + $0x8] sm:$0xff] %vm229_vm0, %v706_v0  ;;  %v238_v3 = vld [vmem:[%s196_s18] sm:$0xff]  ;;  %v243_v4 = vpack.c.bf16 %v241_v2, %v239_v1  ;;  %v240_v5 = vld [vmem:[%s196_s18 + $0x10] sm:$0xff]  ;;  %vm327_vm1 = vcmask 125952   ;;  %s479_s19 = sshll.u32 %s692_s12, 7 }
  0x3c   : > { %v233_v6 = vld [vmem:[%s187_s20 + $0x8] sm:$0xff]  ;;  %v235_v7 = vld [vmem:[%s187_s20 + $0x18] sm:$0xff]  ;;  %v242_v8 = vpack.c.bf16 %v240_v5, %v238_v3  ;;  %v232_v10 = vld [vmem:[%s187_s20] sm:$0xff]  ;;  %s221_s28 = scalar_lea.vmem [#allocation8], %s467_s21  ;;  %s865_s8 = scalar_lea.hbm %s917_s2, %s479_s19 }
  0x3d   : > { %v237_v9 = vpack.c.bf16 %v235_v7, %v233_v6  ;;  %260 = vmatprep.subr.bf16.mxu0 %v243_v4  ;;  %v234_v11 = vld [vmem:[%s187_s20 + $0x10] sm:$0xff]  ;;  %s344_s29 = sshll.u32 %s221_s28, 4  ;;  %s331_s15 = scalar_lea.sflag [#allocation5], %s839_s25  ;;  %s867_s29 = int_to_ptr.vmem [resolvable:$true] %s344_s29 }
  0x3e   : > { %261 = vmatpush1.bf16.xpose.msra.mxu0 %v242_v8  ;;  %v236_v12 = vpack.c.bf16 %v234_v11, %v232_v10  ;;  %s616_s16 = scalar_lea.vmem %s867_s29, 128  ;;  %s707_s12 = smov [#allocation8]  }
  0x3f   : > { %278 = vmatprep.mubr.bf16.mxu0 %v237_v9  ;;  %p617_p8 = scmp.ne.s32.totalorder %s867_s29, %s616_s16  ;;  %s620_s30 = sshll.u32 %s707_s12, 4  ;;  %s621_s30 = int_to_ptr.vmem [resolvable:$false] %s620_s30 }
  0x40   : > { %s622_s4 = scalar_lea.vmem %s621_s30, 256  ;;  %p623_p5 = scmp.lt.s32.totalorder %s867_s29, %s621_s30 }
  0x41   : > { %p618_p0 = pnand %p617_p8, %p776_p9  ;;  %p624_p6 = scmp.lt.s32.totalorder %s622_s4, %s616_s16 }
  0x42   : > { %v244_v13 = vld [vmem:[#allocation2] sm:$0xff]  ;;  %v245_v17 = vld [vmem:[#allocation2 + $0x8] sm:$0xff] }
  0x43   : > { %p619_p2 = pneg %p618_p0  ;;  %p625_p4 = por %p624_p6, %p623_p5 }
  0x45   : > { %279 = vmatmul.mubr.bf16.vlgmr.msra.gmra.mxu0 %v236_v12  ;;  %p626_p7 = pnand %p625_p4, %p619_p2 }
 0x105   : > { %v280_v14 = vpop.f32.mrf.mxu0 }
 0x106   : > { %v287_v15 = vadd.f32 %v280_v14, %v244_v13 }
 0x107   : > { %v282_v16 = vpop.f32.mrf.mxu0 }
 0x108   : > { %290 = vst.msk [vmem:[#allocation2] sm:$0xff] %vm229_vm0, %v287_v15 }
 0x109   : > { %v283_v18 = vpop.f32.mrf.mxu0 }
 0x10a   : > { %v288_v19 = vadd.f32 %v283_v18, %v245_v17 }
 0x10b   : > { %v285_v20 = vpop.f32.mrf.mxu0 }
 0x10c   : > { %291 = vst.msk [vmem:[#allocation2 + $0x8] sm:$0xff] %vm229_vm0, %v288_v19 }
 0x10f   : > { %v295_v21 = vld [vmem:[#allocation2] sm:$0xff] }
 0x110   : > { %v297_v22 = vsel %vm229_vm0, %v295_v21, -inf }
 0x111   : > { %298 = vmax.xlane.f32.xlu0 %v297_v22 }
 0x113   : > { %v296_v23 = vld [vmem:[#allocation2 + $0x8] sm:$0xff] }
 0x114   : > { %v300_v24 = vsel %vm229_vm0, %v296_v23, -inf }
 0x115   : > { %301 = vmax.xlane.f32.xlu0 %v300_v24 }
 0x19a   : > { %v299_v25 = vpop.xlane.xlu0 %298 }
 0x19b   : > { %v303_v26 = vsub.f32 %v295_v21, %v299_v25 }
 0x19d   : > { %v305_v27 = vmul.f32 1.442695, %v303_v26 }
 0x19e   : > { %v302_v28 = vpop.xlane.xlu0 %301 }
 0x19f   : > { %552 = vpow2.f32 %v305_v27  ;;  %v304_v29 = vsub.f32 %v296_v23, %v302_v28 }
 0x1a1   : > { %v307_v30 = vmul.f32 1.442695, %v304_v29 }
 0x1a3   : > { %554 = vpow2.f32 %v307_v30 }
 0x1ac   : > { %v553_v31 = vpop.eup %552 }
 0x1ad   : > { %v309_v32 = vsel %vm229_vm0, %v553_v31, 0.0 }
 0x1ae   : > { %310 = vadd.xlane.f32.xlu1 %v309_v32 }
 0x1b0   : > { %v555_v33 = vpop.eup %554 }
 0x1b1   : > { %v312_v34 = vsel %vm229_vm0, %v555_v33, 0.0 }
 0x1b2   : > { %313 = vadd.xlane.f32.xlu1 %v312_v34 }
 0x237   : > { %v311_v35 = vpop.xlane.xlu1 %310 }
 0x238   : > { %556 = vrcp.f32 %v311_v35 }
 0x23b   : > { %v314_v36 = vpop.xlane.xlu1 %313 }
 0x23c   : > { %558 = vrcp.f32 %v314_v36 }
 0x245   : > { %v557_v37 = vpop.eup %556 }
 0x246   : > { %v317_v38 = vmul.f32 %v557_v37, %v553_v31 }
 0x248   : > { %v477_v39 = vpack.c.bf16 %v317_v38, %v317_v38 }
 0x249   : > { %v559_v40 = vpop.eup %558 }
 0x24a   : > { %v318_v41 = vmul.f32 %v559_v40, %v555_v33  ;;  %328 = vst.msk [vmem:[%s221_s28] sm:$0xf] %vm327_vm1, %v477_v39 }
 0x24c   : > { %v478_v42 = vpack.c.bf16 %v318_v41, %v318_v41 }
 0x24e   : > { %329 = vst.msk [vmem:[%s221_s28 + $0x4] sm:$0xf] %vm327_vm1, %v478_v42 }
 0x24f   : > { %629 = shalt.err (!%p626_p7)
}
 0x250   : > { %s630_s27 = scalar_lea.hbm %s865_s8, 128  ;;  %s634_s20 = scalar_lea.hbm %s917_s2, 256 }
 0x251   : > { %p631_p10 = scmp.ne.s32.totalorder %s865_s8, %s630_s27  ;;  %p635_p3 = scmp.lt.s32.totalorder %s865_s8, %s917_s2 }
 0x252   : > { %p636_p8 = scmp.lt.s32.totalorder %s634_s20, %s630_s27 }
 0x253   : > { %p632_p1 = pnand %p631_p10, %p776_p9 }
 0x254   : > { %p637_p0 = por %p636_p8, %p635_p3 }
 0x255   : > { %p633_p13 = pneg %p632_p1 }
 0x257   : > { %p638_p2 = pnand %p637_p0, %p633_p13 }
 0x259   : > { %641 = shalt.err (!%p638_p2)
}
 0x25a   : > { %s708_s21 = smov 64   ;;  %s709_s19 = smov 4  }
 0x25b   : > { %484 = dma.vmem_to_hbm [thread:$0]  (%p776_p9), %s867_s29, 128, %s865_s8, %s331_s15, %s708_s21, %s708_s21, %s709_s19  }
 0x25c PF: > { %s359_s28 = sand.u32 1, %s680_s9   ;;  %p494_p5 = pnand %p457_p12, %p783_p11 }
 0x25d   : > { %s360_s3 = scalar_lea.sflag [#allocation5], %s359_s28 }
 0x25e   : > { %p495_p6 = pneg %p494_p5 }
 0x260   : > { %675 = dma.done.wait (%p495_p6), %s360_s3, 128  }
 0x261   : > { %677 = vsyncadd (%p495_p6), %s360_s3, 4294967168  ;;  %s21_s14 = sadd.s32 1, %s700_s14   ;;  %s924_s9 = smov %s684_s10 }
 0x262   : > { %p18_p4 = scmp.ge.s32.totalorder %s21_s14, 4   ;;  %s925_s10 = smov %s688_s11 }
 0x263   : > { %s926_s11 = smov %s781_s23  ;;  %s927_s12 = smov %s696_s13 }
 0x264   : > { %s928_s13 = smov %s930_s17  ;;  %20 = sbr.rel (!%p18_p4) target bundleno = 8 (0x8), region = 94 }
 0x269   :  { %365 = vsyncpa [#allocation4], 1 }
 0x26a   :  { %367 = vsyncpa [#allocation4 + $0x1], 1 }
 0x26b   :  { %368 = vsyncpa [#allocation7], 1 }
 0x26c   :  { %370 = vsyncpa [#allocation7 + $0x1], 1 }
 0x26d   :  { %371 = vsyncpa [#allocation5], 1 }
 0x26e   :  { %373 = vsyncpa [#allocation5 + $0x1], 1 }

</bundles_post_ra>
